<compile_context>
chip_gen: v7x
topology: tpu7x:2x2x1
jax: 0.10.0
libtpu: 0.0.40
codegen_flags: <defaults>
</compile_context>

<pallas_src>
import functools

import jax
import jax.numpy as jnp
from jax.experimental import pallas as pl
from jax.experimental.pallas import tpu as pltpu


def _round_up(x: int, m: int) -> int:
    return ((x + m - 1) // m) * m


def _mlp_kernel(x_ref, *rest, num_layers: int, use_bf16: bool):
    """rest = (w0, b0, w1, b1, ..., w_{L-1}, b_{L-1}, o_ref)."""
    o_ref = rest[-1]
    compute_dtype = jnp.bfloat16 if use_bf16 else jnp.float32

    h = x_ref[...].astype(jnp.float32)
    for i in range(num_layers):
        w = rest[2 * i][...]
        b = rest[2 * i + 1][...]
        h = jnp.dot(h.astype(compute_dtype), w.astype(compute_dtype),
                    preferred_element_type=jnp.float32)
        h = h + b.astype(jnp.float32)          # b is (1, N): broadcast over rows
        if i < num_layers - 1:
            h = jnp.maximum(h, 0.0)            # ReLU on all but the last layer
    o_ref[...] = h.astype(o_ref.dtype)


def mlp_pallas(x2d: jax.Array, params, *, tile_m: int = 512,
               use_bf16: bool = False) -> jax.Array:
    """x2d: [M, D_in]; params: list of (w [K, N], b [N]) -> [M, D_out]."""
    M, d_in = x2d.shape
    num_layers = len(params)
    assert num_layers >= 1

    # --- lane-dense output: zero-pad final layer's N to a multiple of 128.
    w_last, b_last = params[-1]
    n_out = w_last.shape[1]
    n_pad = _round_up(n_out, 128)
    if n_pad != n_out:
        w_last = jnp.pad(w_last, ((0, 0), (0, n_pad - n_out)))
        b_last = jnp.pad(b_last, (0, n_pad - n_out))
    params = list(params[:-1]) + [(w_last, b_last)]
    layer_dims = [(w.shape[0], w.shape[1]) for (w, _) in params]

    # --- pick TILE_M under a conservative VMEM working-set budget
    #     (safe on v7x's 64 MiB physical VMEM and v5e's 16 MiB scoped default
    #      once vmem_limit_bytes is raised below).
    itemsize = 4
    wb_bytes = sum(2 * (k * n + n) * itemsize for k, n in layer_dims)
    max_width = max(n for _, n in layer_dims)
    budget = 24 * 1024 * 1024
    tm = min(_round_up(tile_m, 8), _round_up(M, 8))
    while tm > 8:
        need = (wb_bytes
                + 2 * tm * d_in * itemsize        # double-buffered x tile
                + 2 * tm * n_pad * itemsize       # double-buffered out tile
                + 2 * tm * max_width * itemsize)  # live intermediate activations
        if need <= budget:
            break
        tm = max(8, _round_up(tm // 2, 8))

    m_pad = _round_up(M, tm)
    if m_pad != M:
        x2d = jnp.pad(x2d, ((0, m_pad - M), (0, 0)))

    grid = (m_pad // tm,)

    in_specs = [pl.BlockSpec((tm, d_in), lambda i: (i, 0))]
    inputs = [x2d]
    for (w, b) in params:
        k, n = w.shape
        in_specs.append(pl.BlockSpec((k, n), lambda i: (0, 0)))   # resident weight
        in_specs.append(pl.BlockSpec((1, n), lambda i: (0, 0)))   # resident bias
        inputs.append(w)
        inputs.append(b.reshape(1, n))

    kernel = functools.partial(_mlp_kernel, num_layers=num_layers,
                               use_bf16=use_bf16)

    out = pl.pallas_call(
        kernel,
        out_shape=jax.ShapeDtypeStruct((m_pad, n_pad), x2d.dtype),
        grid_spec=pl.GridSpec(
            grid=grid,
            in_specs=in_specs,
            out_specs=pl.BlockSpec((tm, n_pad), lambda i: (i, 0)),
        ),
        compiler_params=pltpu.CompilerParams(
            dimension_semantics=("parallel",),     # megacore / 2-TC sharding (v7x)
            vmem_limit_bytes=48 * 1024 * 1024,     # < 64 MiB v7x physical
        ),
    )(*inputs)

    return out[:M, :n_out]


class MLPPallas:
    """Mirror of models/detr.py::MLP: num_layers Linears, ReLU on all but last."""

    def __init__(self, input_dim, hidden_dim, output_dim, num_layers, key):
        self.num_layers = num_layers
        h = [hidden_dim] * (num_layers - 1)
        dims_in = [input_dim] + h
        dims_out = h + [output_dim]
        self.params = []
        for n_in, n_out in zip(dims_in, dims_out):
            key, wk, bk = jax.random.split(key, 3)
            # Deterministic init ~ nn.Linear's uniform(-1/sqrt(n), 1/sqrt(n)).
            bound = 1.0 / (n_in ** 0.5)
            w = jax.random.uniform(wk, (n_in, n_out), jnp.float32, -bound, bound)
            b = jax.random.uniform(bk, (n_out,), jnp.float32, -bound, bound)
            self.params.append((w, b))

    def __call__(self, x, *, use_bf16: bool = False):
        lead = x.shape[:-1]
        x2d = x.reshape(-1, x.shape[-1])
        y2d = mlp_pallas(x2d, self.params, use_bf16=use_bf16)
        return y2d.reshape(*lead, y2d.shape[-1])


def _reference_mlp(x, params, num_layers):
    x2d = x.reshape(-1, x.shape[-1])
    for i, (w, b) in enumerate(params):
        x2d = x2d @ w + b
        if i < num_layers - 1:
            x2d = jnp.maximum(x2d, 0.0)
    return x2d.reshape(*x.shape[:-1], x2d.shape[-1])


if __name__ == "__main__":
    key = jax.random.PRNGKey(0)
    key, xk, pk, xk2 = jax.random.split(key, 4)

    # DETR-bbox-head-like config: 3 layers, hidden 32, output 4.
    B, S, D_IN, HIDDEN, D_OUT, NUM_LAYERS = 2, 8, 32, 32, 4, 3

    mlp = MLPPallas(D_IN, HIDDEN, D_OUT, NUM_LAYERS, pk)

    # Test 1: small shape (single tile).
    x = jax.random.normal(xk, (B, S, D_IN), jnp.float32)
    out = jax.block_until_ready(mlp(x))
    ref = _reference_mlp(x, mlp.params, NUM_LAYERS)
    assert out.shape == (B, S, D_OUT), out.shape
    assert jnp.allclose(out, ref, atol=1e-5, rtol=1e-5), "mismatch vs reference (small)"

    # Test 2: exercises M tiling (grid > 1) and row padding.
    x2 = jax.random.normal(xk2, (4, 600, D_IN), jnp.float32)   # M = 2400
    out2 = jax.block_until_ready(mlp(x2))
    ref2 = _reference_mlp(x2, mlp.params, NUM_LAYERS)
    assert out2.shape == (4, 600, D_OUT), out2.shape
    assert jnp.allclose(out2, ref2, atol=1e-5, rtol=1e-5), "mismatch vs reference (tiled)"

    print("KERNEL_OK")
</pallas_src>

<mosaic_0001>
module attributes {stable_mosaic.version = 11 : i64} {
  func.func @_mlp_kernel(%arg0: i32, %arg1: memref<16x32xf32, #tpu.memory_space<vmem>>, %arg2: memref<32x32xf32, #tpu.memory_space<vmem>>, %arg3: memref<1x32xf32, #tpu.memory_space<vmem>>, %arg4: memref<32x32xf32, #tpu.memory_space<vmem>>, %arg5: memref<1x32xf32, #tpu.memory_space<vmem>>, %arg6: memref<32x128xf32, #tpu.memory_space<vmem>>, %arg7: memref<1x128xf32, #tpu.memory_space<vmem>>, %arg8: memref<16x128xf32, #tpu.memory_space<vmem>>) attributes {dimension_semantics = [#tpu.dimension_semantics<parallel>], iteration_bounds = array<i64: 1>, scalar_prefetch = 0 : i64, scratch_operands = 0 : i64, tpu.core_type = #tpu.core_type<tc>, window_params = [{transform_indices = @transform_0, window_bounds = array<i64: 16, 32>}, {pipeline_mode = #tpu.pipeline_mode<synchronous>, transform_indices = @transform_1, window_bounds = array<i64: 32, 32>}, {pipeline_mode = #tpu.pipeline_mode<synchronous>, transform_indices = @transform_2, window_bounds = array<i64: 1, 32>}, {pipeline_mode = #tpu.pipeline_mode<synchronous>, transform_indices = @transform_3, window_bounds = array<i64: 32, 32>}, {pipeline_mode = #tpu.pipeline_mode<synchronous>, transform_indices = @transform_4, window_bounds = array<i64: 1, 32>}, {pipeline_mode = #tpu.pipeline_mode<synchronous>, transform_indices = @transform_5, window_bounds = array<i64: 32, 128>}, {pipeline_mode = #tpu.pipeline_mode<synchronous>, transform_indices = @transform_6, window_bounds = array<i64: 1, 128>}, {transform_indices = @transform_7, window_bounds = array<i64: 16, 128>}]} {
    %c0 = arith.constant 0 : index
    %c0_0 = arith.constant 0 : index
    %0 = vector.load %arg1[%c0, %c0_0] : memref<16x32xf32, #tpu.memory_space<vmem>>, vector<16x32xf32>
    %c0_1 = arith.constant 0 : index
    %c0_2 = arith.constant 0 : index
    %1 = vector.load %arg2[%c0_1, %c0_2] : memref<32x32xf32, #tpu.memory_space<vmem>>, vector<32x32xf32>
    %c0_3 = arith.constant 0 : index
    %c0_4 = arith.constant 0 : index
    %2 = vector.load %arg3[%c0_3, %c0_4] : memref<1x32xf32, #tpu.memory_space<vmem>>, vector<1x32xf32>
    %cst = arith.constant dense<0.000000e+00> : vector<16x32xf32>
    %3 = tpu.matmul %0, %1, %cst {dimension_numbers = #tpu.dot_dimension_numbers<[1], [0], [0], [1], [0, 0, 1, 1], [], []>} : vector<16x32xf32>, vector<32x32xf32>, vector<16x32xf32> -> vector<16x32xf32>
    %4 = vector.broadcast %2 : vector<1x32xf32> to vector<16x32xf32>
    %5 = arith.addf %3, %4 : vector<16x32xf32>
    %cst_5 = arith.constant 0.000000e+00 : f32
    %6 = vector.broadcast %cst_5 : f32 to vector<16x32xf32>
    %7 = arith.maximumf %5, %6 : vector<16x32xf32>
    %c0_6 = arith.constant 0 : index
    %c0_7 = arith.constant 0 : index
    %8 = vector.load %arg4[%c0_6, %c0_7] : memref<32x32xf32, #tpu.memory_space<vmem>>, vector<32x32xf32>
    %c0_8 = arith.constant 0 : index
    %c0_9 = arith.constant 0 : index
    %9 = vector.load %arg5[%c0_8, %c0_9] : memref<1x32xf32, #tpu.memory_space<vmem>>, vector<1x32xf32>
    %cst_10 = arith.constant dense<0.000000e+00> : vector<16x32xf32>
    %10 = tpu.matmul %7, %8, %cst_10 {dimension_numbers = #tpu.dot_dimension_numbers<[1], [0], [0], [1], [0, 0, 1, 1], [], []>} : vector<16x32xf32>, vector<32x32xf32>, vector<16x32xf32> -> vector<16x32xf32>
    %11 = vector.broadcast %9 : vector<1x32xf32> to vector<16x32xf32>
    %12 = arith.addf %10, %11 : vector<16x32xf32>
    %cst_11 = arith.constant 0.000000e+00 : f32
    %13 = vector.broadcast %cst_11 : f32 to vector<16x32xf32>
    %14 = arith.maximumf %12, %13 : vector<16x32xf32>
    %c0_12 = arith.constant 0 : index
    %c0_13 = arith.constant 0 : index
    %15 = vector.load %arg6[%c0_12, %c0_13] : memref<32x128xf32, #tpu.memory_space<vmem>>, vector<32x128xf32>
    %c0_14 = arith.constant 0 : index
    %c0_15 = arith.constant 0 : index
    %16 = vector.load %arg7[%c0_14, %c0_15] : memref<1x128xf32, #tpu.memory_space<vmem>>, vector<1x128xf32>
    %cst_16 = arith.constant dense<0.000000e+00> : vector<16x128xf32>
    %17 = tpu.matmul %14, %15, %cst_16 {dimension_numbers = #tpu.dot_dimension_numbers<[1], [0], [0], [1], [0, 0, 1, 1], [], []>} : vector<16x32xf32>, vector<32x128xf32>, vector<16x128xf32> -> vector<16x128xf32>
    %18 = vector.broadcast %16 : vector<1x128xf32> to vector<16x128xf32>
    %19 = arith.addf %17, %18 : vector<16x128xf32>
    %c0_17 = arith.constant 0 : index
    %c0_18 = arith.constant 0 : index
    %20 = vector.load %arg8[%c0_17, %c0_18] : memref<16x128xf32, #tpu.memory_space<vmem>>, vector<16x128xf32>
    tpu.vector_store %arg8[%c0_17, %c0_18], %19 {strides = array<i32>} : memref<16x128xf32, #tpu.memory_space<vmem>>, vector<16x128xf32>,
    return
  }
  func.func @transform_0(%arg0: i32) -> (i32, i32) {
    %c0_i32 = arith.constant 0 : i32
    %c0_i32_0 = arith.constant 0 : i32
    return %arg0, %c0_i32 : i32, i32
  }
  func.func @transform_1(%arg0: i32) -> (i32, i32) {
    %c0_i32 = arith.constant 0 : i32
    %c0_i32_0 = arith.constant 0 : i32
    %c0_i32_1 = arith.constant 0 : i32
    return %c0_i32, %c0_i32_0 : i32, i32
  }
  func.func @transform_2(%arg0: i32) -> (i32, i32) {
    %c0_i32 = arith.constant 0 : i32
    %c0_i32_0 = arith.constant 0 : i32
    %c0_i32_1 = arith.constant 0 : i32
    return %c0_i32, %c0_i32_0 : i32, i32
  }
  func.func @transform_3(%arg0: i32) -> (i32, i32) {
    %c0_i32 = arith.constant 0 : i32
    %c0_i32_0 = arith.constant 0 : i32
    %c0_i32_1 = arith.constant 0 : i32
    return %c0_i32, %c0_i32_0 : i32, i32
  }
  func.func @transform_4(%arg0: i32) -> (i32, i32) {
    %c0_i32 = arith.constant 0 : i32
    %c0_i32_0 = arith.constant 0 : i32
    %c0_i32_1 = arith.constant 0 : i32
    return %c0_i32, %c0_i32_0 : i32, i32
  }
  func.func @transform_5(%arg0: i32) -> (i32, i32) {
    %c0_i32 = arith.constant 0 : i32
    %c0_i32_0 = arith.constant 0 : i32
    %c0_i32_1 = arith.constant 0 : i32
    return %c0_i32, %c0_i32_0 : i32, i32
  }
  func.func @transform_6(%arg0: i32) -> (i32, i32) {
    %c0_i32 = arith.constant 0 : i32
    %c0_i32_0 = arith.constant 0 : i32
    %c0_i32_1 = arith.constant 0 : i32
    return %c0_i32, %c0_i32_0 : i32, i32
  }
  func.func @transform_7(%arg0: i32) -> (i32, i32) {
    %c0_i32 = arith.constant 0 : i32
    %c0_i32_0 = arith.constant 0 : i32
    return %arg0, %c0_i32 : i32, i32
  }
}

</mosaic_0001>

<bundles_post_ra>
// kernel: tpu_custom_call.1
= control target key start
LH: loop header
LB: loop body
LE: loop exit
PB: predicated region body
PF: predicated region fallthrough
CT: control target
= control target key end

     0   :  { %12 = vsyncpa [#allocation3], 0  ;;  %s746_s0 = inlined_call_operand.hbm [shape: f32[16,32], index: 0, kind: input, shape index: {}]   ;;  %s747_s1 = inlined_call_operand.hbm [shape: f32[32,32], index: 1, kind: input, shape index: {}]   ;;  %s748_s2 = inlined_call_operand.vmem [shape: f32[1,32], index: 2, kind: input, shape index: {}]   ;;  %s749_s3 = inlined_call_operand.hbm [shape: f32[32,32], index: 3, kind: input, shape index: {}]   ;;  %s750_s4 = inlined_call_operand.vmem [shape: f32[1,32], index: 4, kind: input, shape index: {}]   ;;  %s751_s5 = inlined_call_operand.hbm [shape: f32[32,128], index: 5, kind: input, shape index: {}]   ;;  %s752_s6 = inlined_call_operand.vmem [shape: f32[1,128], index: 6, kind: input, shape index: {}]   ;;  %s753_s7 = inlined_call_operand.hbm [shape: f32[16,128], index: 7, kind: output, shape index: {}]  }
   0x1   :  { %13 = vsyncpa [#allocation6], 0 }
   0x2   :  { %14 = vsyncpa [#allocation9], 0 }
   0x3   :  { %15 = vsyncpa [#allocation4], 0  ;;  %s595_s24 = smov [#allocation5]   ;;  %s596_s26 = smov [#allocation2]  }
   0x4   :  { %s33_s25 = sshll.u32 %s595_s24, 4  ;;  %s21_s27 = sshll.u32 %s596_s26, 4  ;;  %s34_s25 = int_to_ptr.vmem [resolvable:$true] %s33_s25  ;;  %s642_s27 = int_to_ptr.vmem [resolvable:$true] %s21_s27 }
   0x5   :  { %s477_s30 = scalar_lea.hbm %s747_s1, 512 }
   0x6   :  { %p478_p0 = scmp.ne.s32.totalorder %s747_s1, %s477_s30  ;;  %p481_p1 = scmp.lt.u32.totalorder %s477_s30, %s747_s1 }
   0x8   :  { %p483_p2 = pnand %p481_p1, %p478_p0 }
   0xa   :  { %486 = shalt.err (!%p483_p2)
}
   0xb   :  { %s487_s12 = scalar_lea.vmem %s34_s25, 512  ;;  %p492_p4 = scmp.lt.s32.totalorder %s34_s25, %s34_s25 }
   0xc   :  { %p488_p3 = scmp.ne.s32.totalorder %s34_s25, %s487_s12  ;;  %p493_p5 = scmp.lt.s32.totalorder %s487_s12, %s487_s12 }
   0xe   :  { %p494_p6 = por %p493_p5, %p492_p4 }
  0x10   :  { %p495_p7 = pnand %p494_p6, %p488_p3 }
  0x12   :  { %498 = shalt.err (!%p495_p7)
}
  0x13   :  { %s597_s13 = smov 128   ;;  %s598_s14 = smov 8  }
  0x14   :  { %39 = dma.hbm_to_vmem [thread:$0]  %s747_s1, 512, %s34_s25, [#allocation6], %s597_s13, %s597_s13, %s598_s14  }
  0x15   :  { %s499_s19 = scalar_lea.hbm %s746_s0, 256 }
  0x16   :  { %p500_p8 = scmp.ne.s32.totalorder %s746_s0, %s499_s19  ;;  %p503_p9 = scmp.lt.u32.totalorder %s499_s19, %s746_s0 }
  0x18   :  { %p505_p10 = pnand %p503_p9, %p500_p8 }
  0x1a   :  { %508 = shalt.err (!%p505_p10)
}
  0x1b   :  { %s509_s24 = scalar_lea.vmem %s642_s27, 256  ;;  %p514_p12 = scmp.lt.s32.totalorder %s642_s27, %s642_s27 }
  0x1c   :  { %p510_p11 = scmp.ne.s32.totalorder %s642_s27, %s509_s24  ;;  %p515_p13 = scmp.lt.s32.totalorder %s509_s24, %s509_s24 }
  0x1e   :  { %p516_p0 = por %p515_p13, %p514_p12 }
  0x20   :  { %p517_p1 = pnand %p516_p0, %p510_p11 }
  0x22   :  { %520 = shalt.err (!%p517_p1)
}
  0x23   :  { %27 = dma.hbm_to_vmem [thread:$0]  %s746_s0, 256, %s642_s27, [#allocation3], %s597_s13, %s597_s13, %s598_s14  }
  0x24   :  { %s599_s26 = smov [#allocation7]   ;;  %s600_s29 = smov [#allocation8]  }
  0x25   :  { %s47_s28 = sshll.u32 %s599_s26, 4  ;;  %s61_s30 = sshll.u32 %s600_s29, 4  ;;  %s48_s28 = int_to_ptr.vmem [resolvable:$true] %s47_s28  ;;  %s679_s30 = int_to_ptr.vmem [resolvable:$true] %s61_s30 }
  0x26   :  { %s521_s10 = scalar_lea.hbm %s749_s3, 512 }
  0x27   :  { %p522_p2 = scmp.ne.s32.totalorder %s749_s3, %s521_s10  ;;  %p525_p3 = scmp.lt.u32.totalorder %s521_s10, %s749_s3 }
  0x29   :  { %p527_p4 = pnand %p525_p3, %p522_p2 }
  0x2b   :  { %530 = shalt.err (!%p527_p4)
}
  0x2c   :  { %s531_s0 = scalar_lea.vmem %s48_s28, 512  ;;  %p536_p6 = scmp.lt.s32.totalorder %s48_s28, %s48_s28 }
  0x2d   :  { %p532_p5 = scmp.ne.s32.totalorder %s48_s28, %s531_s0  ;;  %p537_p7 = scmp.lt.s32.totalorder %s531_s0, %s531_s0 }
  0x2f   :  { %p538_p8 = por %p537_p7, %p536_p6 }
  0x31   :  { %p539_p9 = pnand %p538_p8, %p532_p5 }
  0x33   :  { %542 = shalt.err (!%p539_p9)
}
  0x34   :  { %53 = dma.hbm_to_vmem [thread:$0]  %s749_s3, 512, %s48_s28, [#allocation6], %s597_s13, %s597_s13, %s598_s14  }
  0x35   :  { %s543_s20 = scalar_lea.hbm %s751_s5, 512 }
  0x36   :  { %p544_p10 = scmp.ne.s32.totalorder %s751_s5, %s543_s20  ;;  %p547_p11 = scmp.lt.u32.totalorder %s543_s20, %s751_s5 }
  0x38   :  { %p549_p12 = pnand %p547_p11, %p544_p10 }
  0x3a   :  { %552 = shalt.err (!%p549_p12)
}
  0x3b   :  { %s553_s1 = scalar_lea.vmem %s679_s30, 512  ;;  %p558_p0 = scmp.lt.s32.totalorder %s679_s30, %s679_s30 }
  0x3c   :  { %p554_p13 = scmp.ne.s32.totalorder %s679_s30, %s553_s1  ;;  %p559_p1 = scmp.lt.s32.totalorder %s553_s1, %s553_s1 }
  0x3e   :  { %p560_p2 = por %p559_p1, %p558_p0 }
  0x40   :  { %p561_p3 = pnand %p560_p2, %p554_p13 }
  0x42   :  { %564 = shalt.err (!%p561_p3)
}
  0x43   :  { %67 = dma.hbm_to_vmem [thread:$0]  %s751_s5, 512, %s679_s30, [#allocation9], %s597_s13, %s597_s13, %s598_s14  }
  0x44   :  { %587 = dma.done.wait [#allocation3], 256  }
  0x45   :  { %588 = vsyncadd [#allocation3], 4294967040 }
  0x46   :  { %589 = dma.done.wait [#allocation6], 1024  }
  0x47   :  { %590 = vsyncadd [#allocation6], 4294966272 }
  0x48   :  { %591 = dma.done.wait [#allocation9], 512  }
  0x49   :  { %592 = vsyncadd [#allocation9], 4294966784  ;;  %vm95_vm0 = vcmask 261120   ;;  %v84_v0 = vld [vmem:[#allocation5] sm:$0xff]  ;;  %v85_v1 = vld [vmem:[#allocation5 + $0x8] sm:$0xff]  ;;  %s601_s8 = smov [#allocation10]  }
  0x4a   :  { %v86_v2 = vld [vmem:[#allocation5 + $0x10] sm:$0xff]  ;;  %v446_v3 = vpack.c.bf16 %v85_v1, %v84_v0  ;;  %v87_v4 = vld [vmem:[#allocation5 + $0x18] sm:$0xff]  ;;  %v179_v7 = vld [vmem:[#allocation7] sm:$0xff]  ;;  %s372_s9 = sshll.u32 %s601_s8, 4  ;;  %s373_s9 = int_to_ptr.vmem [resolvable:$true] %s372_s9 }
  0x4b   :  { %v82_v5 = vld [vmem:[#allocation2] sm:$0xff]  ;;  %v450_v6 = vpack.c.bf16 %v87_v4, %v86_v2  ;;  %v180_v8 = vld [vmem:[#allocation7 + $0x8] sm:$0xff]  ;;  %v83_v10 = vld [vmem:[#allocation2 + $0x8] sm:$0xff]  ;;  %p570_p5 = scmp.lt.s32.totalorder %s373_s9, %s373_s9 }
  0x4c   :  { %421 = vmatprep.mubr.msk.f32.mxu0 %vm95_vm0, %v82_v5  ;;  %447 = vmatprep.subr.bf16.mxu0 %v446_v3  ;;  %v454_v9 = vpack.c.bf16 %v180_v8, %v179_v7  ;;  %v181_v11 = vld [vmem:[#allocation7 + $0x10] sm:$0xff]  ;;  %v182_v12 = vld [vmem:[#allocation7 + $0x18] sm:$0xff]  ;;  %v273_v14 = vld [vmem:[#allocation8] sm:$0xff] }
  0x4d   :  { %449 = vmatpush3.bf16.msra.mxu0 %v446_v3  ;;  %v458_v13 = vpack.c.bf16 %v182_v12, %v181_v11  ;;  %v274_v15 = vld [vmem:[#allocation8 + $0x8] sm:$0xff]  ;;  %v386_v17 = vld [vmem:[%s748_s2] ss:$0 sm:$0xff]  ;;  %v276_v25 = vld [vmem:[#allocation8 + $0x18] sm:$0xff] }
  0x4e   :  { %451 = vmatprep.subr.bf16.mxu0 %v450_v6  ;;  %455 = vmatprep.subr.bf16.mxu1 %v454_v9  ;;  %v462_v16 = vpack.c.bf16 %v274_v15, %v273_v14  ;;  %v275_v24 = vld [vmem:[#allocation8 + $0x10] sm:$0xff] }
  0x4f   :  { %457 = vmatpush3.bf16.msra.mxu1 %v454_v9  ;;  %v466_v26 = vpack.c.bf16 %v276_v25, %v275_v24  ;;  %v389_v27 = vld [vmem:[%s750_s4] ss:$0 sm:$0xff]  ;;  %s565_s4 = scalar_lea.vmem %s373_s9, 256 }
  0x50   :  { %459 = vmatprep.subr.bf16.mxu1 %v458_v13  ;;  %v392_v34 = vld [vmem:[%s752_s6] ss:$0 sm:$0xff]  ;;  %p566_p4 = scmp.ne.s32.totalorder %s373_s9, %s565_s4  ;;  %p571_p6 = scmp.lt.s32.totalorder %s565_s4, %s565_s4 }
  0x51   :  { %453 = vmatpush3.bf16.msra.mxu0 %v450_v6 }
  0x52   :  { %463 = vmatprep.subr.bf16.mxu0 %v462_v16  ;;  %p572_p7 = por %p571_p6, %p570_p5 }
  0x53   :  { %461 = vmatpush3.bf16.msra.mxu1 %v458_v13 }
  0x54   :  { %422 = vmatmul.mubr.msk.f32.vlgmr.msra.gmra.mrb[0].mxu0 %vm95_vm0, %v83_v10  ;;  %p573_p8 = pnand %p572_p7, %p566_p4 }
  0x55   :  { %465 = vmatpush3.bf16.msra.mxu0 %v462_v16 }
  0x56   :  { %467 = vmatprep.subr.bf16.mxu0 %v466_v26 }
  0x59   :  { %469 = vmatpush3.bf16.msra.mxu0 %v466_v26 }
 0x127   :  { %v423_v18 = vpop.f32.mrb[0].mxu0 }
 0x128   :  { %v174_v19 = vadd.f32 %v423_v18, %v386_v17  ;;  %v168_v20 = vpop.f32.mrb[1].mxu0 }
 0x129   :  { %v169_v21 = vadd.f32 %v386_v17, %v168_v20 }
 0x12a   :  { %v178_v23 = vmax.f32 %v174_v19, 0.0 }
 0x12b   :  { %v177_v22 = vmax.f32 %v169_v21, 0.0 }
 0x12d   :  { %432 = vmatprep.mubr.msk.f32.mxu1 %vm95_vm0, %v177_v22 }
 0x12e   :  { %433 = vmatmul.mubr.msk.f32.vlgmr.msra.gmra.mrb[0].mxu1 %vm95_vm0, %v178_v23 }
 0x201   :  { %v434_v28 = vpop.f32.mrb[0].mxu1 }
 0x202   :  { %v268_v29 = vadd.f32 %v434_v28, %v389_v27  ;;  %v262_v30 = vpop.f32.mrb[1].mxu1 }
 0x203   :  { %v263_v31 = vadd.f32 %v389_v27, %v262_v30 }
 0x204   :  { %v272_v33 = vmax.f32 %v268_v29, 0.0 }
 0x205   :  { %v271_v32 = vmax.f32 %v263_v31, 0.0 }
 0x207   :  { %443 = vmatprep.mubr.msk.f32.mxu0 %vm95_vm0, %v271_v32 }
 0x208   :  { %444 = vmatmul.mubr.msk.f32.vlgmr.msra.gmra.mrb[2].mxu0 %vm95_vm0, %v272_v33 }
 0x2db   :  { %v445_v35 = vpop.f32.mrb[2].mxu0 }
 0x2dc   :  { %v362_v36 = vadd.f32 %v445_v35, %v392_v34  ;;  %v356_v37 = vpop.f32.mrb[3].mxu0 }
 0x2dd   :  { %v357_v38 = vadd.f32 %v392_v34, %v356_v37 }
 0x2de   :  { %366 = vst [vmem:[#allocation10 + $0x8] sm:$0xff] %v362_v36 }
 0x2df   :  { %365 = vst [vmem:[#allocation10] sm:$0xff] %v357_v38 }
 0x2e0   :  { %576 = shalt.err (!%p573_p8)
}
 0x2e1   :  { %s577_s6 = scalar_lea.hbm %s753_s7, 256 }
 0x2e2   :  { %p578_p9 = scmp.ne.s32.totalorder %s753_s7, %s577_s6  ;;  %p581_p10 = scmp.lt.u32.totalorder %s577_s6, %s753_s7 }
 0x2e4   :  { %p583_p11 = pnand %p581_p10, %p578_p9 }
 0x2e6   :  { %586 = shalt.err (!%p583_p11)
}
 0x2e7   :  { %378 = dma.vmem_to_hbm [thread:$0]  %s373_s9, 256, %s753_s7, [#allocation4], %s597_s13, %s597_s13, %s598_s14  }
 0x2e8   :  { %593 = dma.done.wait [#allocation4], 256  }
 0x2e9   :  { %594 = vsyncadd [#allocation4], 4294967040 }
 0x2ea   :  { %382 = vsyncpa [#allocation3], 1 }
 0x2eb   :  { %383 = vsyncpa [#allocation6], 1 }
 0x2ec   :  { %384 = vsyncpa [#allocation9], 1 }
 0x2ed   :  { %385 = vsyncpa [#allocation4], 1 }

</bundles_post_ra>
